<compile_context>
chip_gen: v5e
topology: v5e:2x2
jax: 0.10.0
libtpu: 0.0.40
codegen_flags: <defaults>
</compile_context>

<pallas_src>
import functools

import jax
import jax.numpy as jnp
import numpy as np
from jax.experimental import pallas as pl
from jax.experimental.pallas import tpu as pltpu

BN_EPS = 1e-5


def _kernel_updator_kernel(
    kf_ref, kw_ref,                 # per-instance inputs  [cls,F], [cls,K]
    kcw_ref, kcb_ref,               # kernel_conv_layer    W[K,2F] bf16, b[1,2F] f32
    fcw_ref, fcb_ref,               # feature_conv_layer (live half) W[F,F] bf16, b[1,F]
    gw_ref, gb_ref,                 # fused feature|weights gate W[F,2F] bf16, b[1,2F]
    g4_ref, b4_ref,                 # coalesced BN gamma/beta [1,4F]
    fc2w_ref, fc2b_ref,             # fc_layer W[F,O] bf16, b[1,O]
    fcng_ref, fcnb_ref,             # fc_norm gamma/beta [1,O]
    out_ref,                        # output [cls, O]
    pre_ref,                        # VMEM scratch [cls, 4F] f32 (coalesced pre-BN slab)
    *, num_params: int,
):
    F = num_params
    bf16 = jnp.bfloat16

    kf = kf_ref[...]                # [cls, F] f32
    kw = kw_ref[...]                # [cls, K] f32

    # parameters = kernel_conv_layer(kernel_weights)           [cls, 2F]
    parameters = (
        jnp.dot(kw.astype(bf16), kcw_ref[...], preferred_element_type=jnp.float32)
        + kcb_ref[...]
    )
    param_in = parameters[:, :F]
    param_out = parameters[:, F:]

    # features_in = feature_conv_layer(kernel_feature)[:, :F]  (dead half dropped)
    features_in = (
        jnp.dot(kf.astype(bf16), fcw_ref[...], preferred_element_type=jnp.float32)
        + fcb_ref[...]
    )
    # features_out = features_in[:, -F:] == features_in  (F-wide slab)

    gate_feats = (param_in * features_in).astype(bf16)

    # fused [feature_gate | weights_gate] projection            [cls, 2F]
    gates = (
        jnp.dot(gate_feats, gw_ref[...], preferred_element_type=jnp.float32)
        + gb_ref[...]
    )

    # Coalesced training-mode BatchNorm1d over [fg | wg | features_out | param_out]
    # (BN stats are per-channel, so lane-concatenation is exact.)
    pre_ref[:, : 2 * F] = gates
    pre_ref[:, 2 * F : 3 * F] = features_in
    pre_ref[:, 3 * F :] = param_out
    pre = pre_ref[...]
    mean = jnp.mean(pre, axis=0, keepdims=True)
    var = jnp.mean(jnp.square(pre - mean), axis=0, keepdims=True)
    bn4 = (pre - mean) * jax.lax.rsqrt(var + BN_EPS) * g4_ref[...] + b4_ref[...]

    kernel_feature_gate = jax.nn.sigmoid(bn4[:, :F])
    kernel_weights_gate = jax.nn.sigmoid(bn4[:, F : 2 * F])
    features_out_n = bn4[:, 2 * F : 3 * F]
    param_out_n = bn4[:, 3 * F :]

    mixed = kernel_feature_gate * features_out_n + kernel_weights_gate * param_out_n

    fc = (
        jnp.dot(mixed.astype(bf16), fc2w_ref[...], preferred_element_type=jnp.float32)
        + fc2b_ref[...]
    )
    m2 = jnp.mean(fc, axis=0, keepdims=True)
    v2 = jnp.mean(jnp.square(fc - m2), axis=0, keepdims=True)
    out = (fc - m2) * jax.lax.rsqrt(v2 + BN_EPS) * fcng_ref[...] + fcnb_ref[...]
    out_ref[...] = jnp.maximum(out, 0.0)


def pack_params(params, feature_channels):
    """Fold the per-review structural optimizations into the weight set once:
    drop the dead half of feature_conv, fuse the gate projections, concat the
    four F-wide BN affines, and cast matmul weights to bf16."""
    F = feature_channels
    bf16 = jnp.bfloat16
    return {
        "kc_w": params["kc_w"].astype(bf16),
        "kc_b": params["kc_b"],
        "fconv_w": params["fc_conv_w"][:, :F].astype(bf16),
        "fconv_b": params["fc_conv_b"][:, :F],
        "gate_w": jnp.concatenate(
            [params["fgate_w"], params["wgate_w"]], axis=1).astype(bf16),
        "gate_b": jnp.concatenate([params["fgate_b"], params["wgate_b"]], axis=1),
        "bn4_g": jnp.concatenate(
            [params["fnorm_g"], params["wnorm_g"],
             params["fnorm_out_g"], params["wnorm_out_g"]], axis=1),
        "bn4_b": jnp.concatenate(
            [params["fnorm_b"], params["wnorm_b"],
             params["fnorm_out_b"], params["wnorm_out_b"]], axis=1),
        "fc_w": params["fc_w"].astype(bf16),
        "fc_b": params["fc_b"],
        "fcn_g": params["fcnorm_g"],
        "fcn_b": params["fcnorm_b"],
    }


def kernel_updator_forward(kernel_feature, kernel_weights, packed):
    """kernel_feature/kernel_weights: [cls, C] (single instance, module semantics)
    or [B, cls, C] (B independent instances, one per grid step)."""
    squeeze = kernel_feature.ndim == 2
    if squeeze:
        kernel_feature = kernel_feature[None]
        kernel_weights = kernel_weights[None]
    B, cls, F = kernel_feature.shape
    K = kernel_weights.shape[-1]
    O = packed["fc_w"].shape[1]

    weights = (
        packed["kc_w"], packed["kc_b"],
        packed["fconv_w"], packed["fconv_b"],
        packed["gate_w"], packed["gate_b"],
        packed["bn4_g"], packed["bn4_b"],
        packed["fc_w"], packed["fc_b"],
        packed["fcn_g"], packed["fcn_b"],
    )

    def resident(arr):
        # Whole array in VMEM with a constant block index: DMA'd once and kept
        # resident across the (parallel) batch grid.
        return pl.BlockSpec(arr.shape, lambda b, _nd=arr.ndim: (0,) * _nd)

    in_specs = [
        pl.BlockSpec((None, cls, F), lambda b: (b, 0, 0)),
        pl.BlockSpec((None, cls, K), lambda b: (b, 0, 0)),
    ] + [resident(w) for w in weights]

    flops = 2 * B * cls * (K * 2 * F + F * F + F * 2 * F + F * O)
    weight_bytes = sum(int(w.size) * w.dtype.itemsize for w in weights)
    act_bytes = (int(kernel_feature.size) + int(kernel_weights.size) + B * cls * O) * 4
    cost = pl.CostEstimate(
        flops=flops,
        transcendentals=B * cls * 2 * F,
        bytes_accessed=weight_bytes + act_bytes,
    )

    out = pl.pallas_call(
        functools.partial(_kernel_updator_kernel, num_params=F),
        grid=(B,),
        in_specs=in_specs,
        out_specs=pl.BlockSpec((None, cls, O), lambda b: (b, 0, 0)),
        out_shape=jax.ShapeDtypeStruct((B, cls, O), jnp.float32),
        scratch_shapes=[pltpu.VMEM((cls, 4 * F), jnp.float32)],
        compiler_params=pltpu.CompilerParams(dimension_semantics=("parallel",)),
        cost_estimate=cost,
    )(kernel_feature, kernel_weights, *weights)
    return out[0] if squeeze else out


def init_params(key, feature_channels, kernel_channels, out_channels):
    """Deterministic init mimicking PyTorch defaults (uniform +-1/sqrt(fan_in),
    BatchNorm gamma=1, beta=0). Linear weights stored transposed: [in, out]."""
    F, K, O = feature_channels, kernel_channels, out_channels
    keys = jax.random.split(key, 5)

    def linear(k, fan_in, fan_out):
        bound = 1.0 / np.sqrt(fan_in)
        kw, kb = jax.random.split(k)
        w = jax.random.uniform(kw, (fan_in, fan_out), jnp.float32, -bound, bound)
        b = jax.random.uniform(kb, (1, fan_out), jnp.float32, -bound, bound)
        return w, b

    p = {}
    p["kc_w"], p["kc_b"] = linear(keys[0], K, 2 * F)            # kernel_conv_layer
    p["fc_conv_w"], p["fc_conv_b"] = linear(keys[1], F, 2 * F)  # feature_conv_layer
    p["fgate_w"], p["fgate_b"] = linear(keys[2], F, F)          # feature_gate
    p["wgate_w"], p["wgate_b"] = linear(keys[3], F, F)          # weights_gate
    p["fc_w"], p["fc_b"] = linear(keys[4], F, O)                # fc_layer
    for name, dim in (
        ("fnorm", F), ("wnorm", F), ("fnorm_out", F), ("wnorm_out", F), ("fcnorm", O)
    ):
        p[name + "_g"] = jnp.ones((1, dim), jnp.float32)
        p[name + "_b"] = jnp.zeros((1, dim), jnp.float32)
    return p


def kernel_updator_reference(kernel_feature, kernel_weights, params, F):
    """Pure-JAX single-instance reference mirroring the module (bf16 matmul
    operands, f32 accumulation, training-mode BatchNorm)."""
    bf16 = jnp.bfloat16

    def dot(a, w):
        return jnp.dot(a.astype(bf16), w.astype(bf16),
                       preferred_element_type=jnp.float32)

    def bn(x, g, b):
        mean = jnp.mean(x, axis=0, keepdims=True)
        var = jnp.mean(jnp.square(x - mean), axis=0, keepdims=True)
        return (x - mean) / jnp.sqrt(var + BN_EPS) * g + b

    parameters = dot(kernel_weights, params["kc_w"]) + params["kc_b"]
    param_in, param_out = parameters[:, :F], parameters[:, F:]
    features = dot(kernel_feature, params["fc_conv_w"]) + params["fc_conv_b"]
    features_in = features[:, :F]
    features_out = features_in
    gate_feats = param_in * features_in
    kfg = jax.nn.sigmoid(
        bn(dot(gate_feats, params["fgate_w"]) + params["fgate_b"],
           params["fnorm_g"], params["fnorm_b"]))
    kwg = jax.nn.sigmoid(
        bn(dot(gate_feats, params["wgate_w"]) + params["wgate_b"],
           params["wnorm_g"], params["wnorm_b"]))
    features_out = bn(features_out, params["fnorm_out_g"], params["fnorm_out_b"])
    param_out = bn(param_out, params["wnorm_out_g"], params["wnorm_out_b"])
    mixed = kfg * features_out + kwg * param_out
    fc = dot(mixed, params["fc_w"]) + params["fc_b"]
    return jnp.maximum(bn(fc, params["fcnorm_g"], params["fcnorm_b"]), 0.0)


if __name__ == "__main__":
    feature_channels = 128
    kernel_channels = 128
    out_channels = 128
    cls = 8      # number of classes per instance
    B = 4        # stacked independent instances (fills the parallel grid)

    key = jax.random.PRNGKey(0)
    k_feat, k_wts, k_params = jax.random.split(key, 3)

    kernel_feature = jax.random.normal(k_feat, (B, cls, feature_channels), jnp.float32)
    kernel_weights = jax.random.normal(k_wts, (B, cls, kernel_channels), jnp.float32)
    params = init_params(k_params, feature_channels, kernel_channels, out_channels)
    packed = pack_params(params, feature_channels)

    # batched path (grid over instances, per-instance BatchNorm)
    out = kernel_updator_forward(kernel_feature, kernel_weights, packed)
    out = jax.block_until_ready(out)
    for b in range(B):
        ref = kernel_updator_reference(kernel_feature[b], kernel_weights[b],
                                       params, feature_channels)
        np.testing.assert_allclose(np.asarray(out[b]), np.asarray(ref),
                                   rtol=2e-3, atol=2e-3)

    # single-instance (2-D) path, matching the original module signature
    out0 = kernel_updator_forward(kernel_feature[0], kernel_weights[0], packed)
    out0 = jax.block_until_ready(out0)
    ref0 = kernel_updator_reference(kernel_feature[0], kernel_weights[0],
                                    params, feature_channels)
    np.testing.assert_allclose(np.asarray(out0), np.asarray(ref0),
                               rtol=2e-3, atol=2e-3)

    print("KERNEL_OK")
</pallas_src>

<mosaic_0001>
module attributes {stable_mosaic.version = 11 : i64} {
  func.func @_kernel_updator_kernel(%arg0: i32, %arg1: memref<1x8x128xf32, #tpu.memory_space<vmem>>, %arg2: memref<1x8x128xf32, #tpu.memory_space<vmem>>, %arg3: memref<128x256xbf16, #tpu.memory_space<vmem>>, %arg4: memref<1x256xf32, #tpu.memory_space<vmem>>, %arg5: memref<128x128xbf16, #tpu.memory_space<vmem>>, %arg6: memref<1x128xf32, #tpu.memory_space<vmem>>, %arg7: memref<128x256xbf16, #tpu.memory_space<vmem>>, %arg8: memref<1x256xf32, #tpu.memory_space<vmem>>, %arg9: memref<1x512xf32, #tpu.memory_space<vmem>>, %arg10: memref<1x512xf32, #tpu.memory_space<vmem>>, %arg11: memref<128x128xbf16, #tpu.memory_space<vmem>>, %arg12: memref<1x128xf32, #tpu.memory_space<vmem>>, %arg13: memref<1x128xf32, #tpu.memory_space<vmem>>, %arg14: memref<1x128xf32, #tpu.memory_space<vmem>>, %arg15: memref<1x8x128xf32, #tpu.memory_space<vmem>>, %arg16: memref<8x512xf32, #tpu.memory_space<vmem>>) attributes {dimension_semantics = [#tpu.dimension_semantics<parallel>], iteration_bounds = array<i64: 4>, scalar_prefetch = 0 : i64, scratch_operands = 1 : i64, tpu.core_type = #tpu.core_type<tc>, window_params = [{transform_indices = @transform_0, window_bounds = array<i64: 1, 8, 128>}, {transform_indices = @transform_1, window_bounds = array<i64: 1, 8, 128>}, {pipeline_mode = #tpu.pipeline_mode<synchronous>, transform_indices = @transform_2, window_bounds = array<i64: 128, 256>}, {pipeline_mode = #tpu.pipeline_mode<synchronous>, transform_indices = @transform_3, window_bounds = array<i64: 1, 256>}, {pipeline_mode = #tpu.pipeline_mode<synchronous>, transform_indices = @transform_4, window_bounds = array<i64: 128, 128>}, {pipeline_mode = #tpu.pipeline_mode<synchronous>, transform_indices = @transform_5, window_bounds = array<i64: 1, 128>}, {pipeline_mode = #tpu.pipeline_mode<synchronous>, transform_indices = @transform_6, window_bounds = array<i64: 128, 256>}, {pipeline_mode = #tpu.pipeline_mode<synchronous>, transform_indices = @transform_7, window_bounds = array<i64: 1, 256>}, {pipeline_mode = #tpu.pipeline_mode<synchronous>, transform_indices = @transform_8, window_bounds = array<i64: 1, 512>}, {pipeline_mode = #tpu.pipeline_mode<synchronous>, transform_indices = @transform_9, window_bounds = array<i64: 1, 512>}, {pipeline_mode = #tpu.pipeline_mode<synchronous>, transform_indices = @transform_10, window_bounds = array<i64: 128, 128>}, {pipeline_mode = #tpu.pipeline_mode<synchronous>, transform_indices = @transform_11, window_bounds = array<i64: 1, 128>}, {pipeline_mode = #tpu.pipeline_mode<synchronous>, transform_indices = @transform_12, window_bounds = array<i64: 1, 128>}, {pipeline_mode = #tpu.pipeline_mode<synchronous>, transform_indices = @transform_13, window_bounds = array<i64: 1, 128>}, {transform_indices = @transform_14, window_bounds = array<i64: 1, 8, 128>}]} {
    %c0 = arith.constant 0 : index
    %c0_0 = arith.constant 0 : index
    %c0_1 = arith.constant 0 : index
    %0 = vector.load %arg1[%c0, %c0_0, %c0_1] : memref<1x8x128xf32, #tpu.memory_space<vmem>>, vector<1x8x128xf32>
    %1 = vector.shape_cast %0 : vector<1x8x128xf32> to vector<8x128xf32>
    %c0_2 = arith.constant 0 : index
    %c0_3 = arith.constant 0 : index
    %c0_4 = arith.constant 0 : index
    %2 = vector.load %arg2[%c0_2, %c0_3, %c0_4] : memref<1x8x128xf32, #tpu.memory_space<vmem>>, vector<1x8x128xf32>
    %3 = vector.shape_cast %2 : vector<1x8x128xf32> to vector<8x128xf32>
    %4 = arith.truncf %3 : vector<8x128xf32> to vector<8x128xbf16>
    %c0_5 = arith.constant 0 : index
    %c0_6 = arith.constant 0 : index
    %5 = vector.load %arg3[%c0_5, %c0_6] : memref<128x256xbf16, #tpu.memory_space<vmem>>, vector<128x256xbf16>
    %cst = arith.constant dense<0.000000e+00> : vector<8x256xf32>
    %6 = tpu.matmul %4, %5, %cst {dimension_numbers = #tpu.dot_dimension_numbers<[1], [0], [0], [1], [0, 0, 1, 1], [], []>} : vector<8x128xbf16>, vector<128x256xbf16>, vector<8x256xf32> -> vector<8x256xf32>
    %c0_7 = arith.constant 0 : index
    %c0_8 = arith.constant 0 : index
    %7 = vector.load %arg4[%c0_7, %c0_8] : memref<1x256xf32, #tpu.memory_space<vmem>>, vector<1x256xf32>
    %8 = vector.broadcast %7 : vector<1x256xf32> to vector<8x256xf32>
    %9 = arith.addf %6, %8 : vector<8x256xf32>
    %10 = vector.extract_strided_slice %9 {offsets = [0, 0], sizes = [8, 128], strides = [1, 1]} : vector<8x256xf32> to vector<8x128xf32>
    %11 = vector.extract_strided_slice %9 {offsets = [0, 128], sizes = [8, 128], strides = [1, 1]} : vector<8x256xf32> to vector<8x128xf32>
    %12 = arith.truncf %1 : vector<8x128xf32> to vector<8x128xbf16>
    %c0_9 = arith.constant 0 : index
    %c0_10 = arith.constant 0 : index
    %13 = vector.load %arg5[%c0_9, %c0_10] : memref<128x128xbf16, #tpu.memory_space<vmem>>, vector<128x128xbf16>
    %cst_11 = arith.constant dense<0.000000e+00> : vector<8x128xf32>
    %14 = tpu.matmul %12, %13, %cst_11 {dimension_numbers = #tpu.dot_dimension_numbers<[1], [0], [0], [1], [0, 0, 1, 1], [], []>} : vector<8x128xbf16>, vector<128x128xbf16>, vector<8x128xf32> -> vector<8x128xf32>
    %c0_12 = arith.constant 0 : index
    %c0_13 = arith.constant 0 : index
    %15 = vector.load %arg6[%c0_12, %c0_13] : memref<1x128xf32, #tpu.memory_space<vmem>>, vector<1x128xf32>
    %16 = vector.broadcast %15 : vector<1x128xf32> to vector<8x128xf32>
    %17 = arith.addf %14, %16 : vector<8x128xf32>
    %18 = arith.mulf %10, %17 : vector<8x128xf32>
    %19 = arith.truncf %18 : vector<8x128xf32> to vector<8x128xbf16>
    %c0_14 = arith.constant 0 : index
    %c0_15 = arith.constant 0 : index
    %20 = vector.load %arg7[%c0_14, %c0_15] : memref<128x256xbf16, #tpu.memory_space<vmem>>, vector<128x256xbf16>
    %cst_16 = arith.constant dense<0.000000e+00> : vector<8x256xf32>
    %21 = tpu.matmul %19, %20, %cst_16 {dimension_numbers = #tpu.dot_dimension_numbers<[1], [0], [0], [1], [0, 0, 1, 1], [], []>} : vector<8x128xbf16>, vector<128x256xbf16>, vector<8x256xf32> -> vector<8x256xf32>
    %c0_17 = arith.constant 0 : index
    %c0_18 = arith.constant 0 : index
    %22 = vector.load %arg8[%c0_17, %c0_18] : memref<1x256xf32, #tpu.memory_space<vmem>>, vector<1x256xf32>
    %23 = vector.broadcast %22 : vector<1x256xf32> to vector<8x256xf32>
    %24 = arith.addf %21, %23 : vector<8x256xf32>
    %c0_19 = arith.constant 0 : index
    %c0_20 = arith.constant 0 : index
    %25 = vector.load %arg16[%c0_19, %c0_20] : memref<8x512xf32, #tpu.memory_space<vmem>>, vector<8x256xf32>
    tpu.vector_store %arg16[%c0_19, %c0_20], %24 {strides = array<i32>} : memref<8x512xf32, #tpu.memory_space<vmem>>, vector<8x256xf32>,
    %c0_21 = arith.constant 0 : index
    %c256 = arith.constant 256 : index
    %26 = vector.load %arg16[%c0_21, %c256] : memref<8x512xf32, #tpu.memory_space<vmem>>, vector<8x128xf32>
    tpu.vector_store %arg16[%c0_21, %c256], %17 {strides = array<i32>} : memref<8x512xf32, #tpu.memory_space<vmem>>, vector<8x128xf32>,
    %c0_22 = arith.constant 0 : index
    %c384 = arith.constant 384 : index
    %27 = vector.load %arg16[%c0_22, %c384] : memref<8x512xf32, #tpu.memory_space<vmem>>, vector<8x128xf32>
    tpu.vector_store %arg16[%c0_22, %c384], %11 {strides = array<i32>} : memref<8x512xf32, #tpu.memory_space<vmem>>, vector<8x128xf32>,
    %c0_23 = arith.constant 0 : index
    %c0_24 = arith.constant 0 : index
    %28 = vector.load %arg16[%c0_23, %c0_24] : memref<8x512xf32, #tpu.memory_space<vmem>>, vector<8x512xf32>
    %cst_25 = arith.constant dense<0.000000e+00> : vector<512xf32>
    %29 = vector.multi_reduction <add>, %28, %cst_25 [0] : vector<8x512xf32> to vector<512xf32>
    %30 = vector.shape_cast %29 : vector<512xf32> to vector<1x512xf32>
    %cst_26 = arith.constant 8.000000e+00 : f32
    %31 = vector.broadcast %cst_26 : f32 to vector<1x512xf32>
    %32 = arith.divf %30, %31 : vector<1x512xf32>
    %33 = vector.broadcast %32 : vector<1x512xf32> to vector<8x512xf32>
    %34 = arith.subf %28, %33 : vector<8x512xf32>
    %35 = arith.mulf %34, %34 : vector<8x512xf32>
    %cst_27 = arith.constant dense<0.000000e+00> : vector<512xf32>
    %36 = vector.multi_reduction <add>, %35, %cst_27 [0] : vector<8x512xf32> to vector<512xf32>
    %37 = vector.shape_cast %36 : vector<512xf32> to vector<1x512xf32>
    %cst_28 = arith.constant 8.000000e+00 : f32
    %38 = vector.broadcast %cst_28 : f32 to vector<1x512xf32>
    %39 = arith.divf %37, %38 : vector<1x512xf32>
    %40 = vector.broadcast %32 : vector<1x512xf32> to vector<8x512xf32>
    %41 = arith.subf %28, %40 : vector<8x512xf32>
    %cst_29 = arith.constant 9.99999974E-6 : f32
    %42 = vector.broadcast %cst_29 : f32 to vector<1x512xf32>
    %43 = arith.addf %39, %42 : vector<1x512xf32>
    %44 = math.rsqrt %43 : vector<1x512xf32>
    %45 = vector.broadcast %44 : vector<1x512xf32> to vector<8x512xf32>
    %46 = arith.mulf %41, %45 : vector<8x512xf32>
    %c0_30 = arith.constant 0 : index
    %c0_31 = arith.constant 0 : index
    %47 = vector.load %arg9[%c0_30, %c0_31] : memref<1x512xf32, #tpu.memory_space<vmem>>, vector<1x512xf32>
    %48 = vector.broadcast %47 : vector<1x512xf32> to vector<8x512xf32>
    %49 = arith.mulf %46, %48 : vector<8x512xf32>
    %c0_32 = arith.constant 0 : index
    %c0_33 = arith.constant 0 : index
    %50 = vector.load %arg10[%c0_32, %c0_33] : memref<1x512xf32, #tpu.memory_space<vmem>>, vector<1x512xf32>
    %51 = vector.broadcast %50 : vector<1x512xf32> to vector<8x512xf32>
    %52 = arith.addf %49, %51 : vector<8x512xf32>
    %53 = vector.extract_strided_slice %52 {offsets = [0, 0], sizes = [8, 128], strides = [1, 1]} : vector<8x512xf32> to vector<8x128xf32>
    %54 = arith.negf %53 : vector<8x128xf32>
    %55 = math.exp %54 : vector<8x128xf32>
    %cst_34 = arith.constant 1.000000e+00 : f32
    %56 = vector.broadcast %cst_34 : f32 to vector<8x128xf32>
    %57 = arith.addf %56, %55 : vector<8x128xf32>
    %58 = arith.divf %56, %57 : vector<8x128xf32>
    %59 = vector.extract_strided_slice %52 {offsets = [0, 128], sizes = [8, 128], strides = [1, 1]} : vector<8x512xf32> to vector<8x128xf32>
    %60 = arith.negf %59 : vector<8x128xf32>
    %61 = math.exp %60 : vector<8x128xf32>
    %cst_35 = arith.constant 1.000000e+00 : f32
    %62 = vector.broadcast %cst_35 : f32 to vector<8x128xf32>
    %63 = arith.addf %62, %61 : vector<8x128xf32>
    %64 = arith.divf %62, %63 : vector<8x128xf32>
    %65 = vector.extract_strided_slice %52 {offsets = [0, 256], sizes = [8, 128], strides = [1, 1]} : vector<8x512xf32> to vector<8x128xf32>
    %66 = vector.extract_strided_slice %52 {offsets = [0, 384], sizes = [8, 128], strides = [1, 1]} : vector<8x512xf32> to vector<8x128xf32>
    %67 = arith.mulf %58, %65 : vector<8x128xf32>
    %68 = arith.mulf %64, %66 : vector<8x128xf32>
    %69 = arith.addf %67, %68 : vector<8x128xf32>
    %70 = arith.truncf %69 : vector<8x128xf32> to vector<8x128xbf16>
    %c0_36 = arith.constant 0 : index
    %c0_37 = arith.constant 0 : index
    %71 = vector.load %arg11[%c0_36, %c0_37] : memref<128x128xbf16, #tpu.memory_space<vmem>>, vector<128x128xbf16>
    %cst_38 = arith.constant dense<0.000000e+00> : vector<8x128xf32>
    %72 = tpu.matmul %70, %71, %cst_38 {dimension_numbers = #tpu.dot_dimension_numbers<[1], [0], [0], [1], [0, 0, 1, 1], [], []>} : vector<8x128xbf16>, vector<128x128xbf16>, vector<8x128xf32> -> vector<8x128xf32>
    %c0_39 = arith.constant 0 : index
    %c0_40 = arith.constant 0 : index
    %73 = vector.load %arg12[%c0_39, %c0_40] : memref<1x128xf32, #tpu.memory_space<vmem>>, vector<1x128xf32>
    %74 = vector.broadcast %73 : vector<1x128xf32> to vector<8x128xf32>
    %75 = arith.addf %72, %74 : vector<8x128xf32>
    %cst_41 = arith.constant dense<0.000000e+00> : vector<128xf32>
    %76 = vector.multi_reduction <add>, %75, %cst_41 [0] : vector<8x128xf32> to vector<128xf32>
    %77 = vector.shape_cast %76 : vector<128xf32> to vector<1x128xf32>
    %cst_42 = arith.constant 8.000000e+00 : f32
    %78 = vector.broadcast %cst_42 : f32 to vector<1x128xf32>
    %79 = arith.divf %77, %78 : vector<1x128xf32>
    %80 = vector.broadcast %79 : vector<1x128xf32> to vector<8x128xf32>
    %81 = arith.subf %75, %80 : vector<8x128xf32>
    %82 = arith.mulf %81, %81 : vector<8x128xf32>
    %cst_43 = arith.constant dense<0.000000e+00> : vector<128xf32>
    %83 = vector.multi_reduction <add>, %82, %cst_43 [0] : vector<8x128xf32> to vector<128xf32>
    %84 = vector.shape_cast %83 : vector<128xf32> to vector<1x128xf32>
    %cst_44 = arith.constant 8.000000e+00 : f32
    %85 = vector.broadcast %cst_44 : f32 to vector<1x128xf32>
    %86 = arith.divf %84, %85 : vector<1x128xf32>
    %87 = vector.broadcast %79 : vector<1x128xf32> to vector<8x128xf32>
    %88 = arith.subf %75, %87 : vector<8x128xf32>
    %cst_45 = arith.constant 9.99999974E-6 : f32
    %89 = vector.broadcast %cst_45 : f32 to vector<1x128xf32>
    %90 = arith.addf %86, %89 : vector<1x128xf32>
    %91 = math.rsqrt %90 : vector<1x128xf32>
    %92 = vector.broadcast %91 : vector<1x128xf32> to vector<8x128xf32>
    %93 = arith.mulf %88, %92 : vector<8x128xf32>
    %c0_46 = arith.constant 0 : index
    %c0_47 = arith.constant 0 : index
    %94 = vector.load %arg13[%c0_46, %c0_47] : memref<1x128xf32, #tpu.memory_space<vmem>>, vector<1x128xf32>
    %95 = vector.broadcast %94 : vector<1x128xf32> to vector<8x128xf32>
    %96 = arith.mulf %93, %95 : vector<8x128xf32>
    %c0_48 = arith.constant 0 : index
    %c0_49 = arith.constant 0 : index
    %97 = vector.load %arg14[%c0_48, %c0_49] : memref<1x128xf32, #tpu.memory_space<vmem>>, vector<1x128xf32>
    %98 = vector.broadcast %97 : vector<1x128xf32> to vector<8x128xf32>
    %99 = arith.addf %96, %98 : vector<8x128xf32>
    %cst_50 = arith.constant 0.000000e+00 : f32
    %100 = vector.broadcast %cst_50 : f32 to vector<8x128xf32>
    %101 = arith.maximumf %99, %100 : vector<8x128xf32>
    %c0_51 = arith.constant 0 : index
    %c0_52 = arith.constant 0 : index
    %c0_53 = arith.constant 0 : index
    %102 = vector.load %arg15[%c0_51, %c0_52, %c0_53] : memref<1x8x128xf32, #tpu.memory_space<vmem>>, vector<1x8x128xf32>
    %103 = vector.shape_cast %102 : vector<1x8x128xf32> to vector<8x128xf32>
    %104 = vector.shape_cast %101 : vector<8x128xf32> to vector<1x8x128xf32>
    tpu.vector_store %arg15[%c0_51, %c0_52, %c0_53], %104 {strides = array<i32>} : memref<1x8x128xf32, #tpu.memory_space<vmem>>, vector<1x8x128xf32>,
    return
  }
  func.func @transform_0(%arg0: i32) -> (i32, i32, i32) {
    %c0_i32 = arith.constant 0 : i32
    %c0_i32_0 = arith.constant 0 : i32
    %c0_i32_1 = arith.constant 0 : i32
    return %arg0, %c0_i32, %c0_i32_0 : i32, i32, i32
  }
  func.func @transform_1(%arg0: i32) -> (i32, i32, i32) {
    %c0_i32 = arith.constant 0 : i32
    %c0_i32_0 = arith.constant 0 : i32
    %c0_i32_1 = arith.constant 0 : i32
    return %arg0, %c0_i32, %c0_i32_0 : i32, i32, i32
  }
  func.func @transform_2(%arg0: i32) -> (i32, i32) {
    %c0_i32 = arith.constant 0 : i32
    %c0_i32_0 = arith.constant 0 : i32
    %c0_i32_1 = arith.constant 0 : i32
    return %c0_i32, %c0_i32_0 : i32, i32
  }
  func.func @transform_3(%arg0: i32) -> (i32, i32) {
    %c0_i32 = arith.constant 0 : i32
    %c0_i32_0 = arith.constant 0 : i32
    %c0_i32_1 = arith.constant 0 : i32
    return %c0_i32, %c0_i32_0 : i32, i32
  }
  func.func @transform_4(%arg0: i32) -> (i32, i32) {
    %c0_i32 = arith.constant 0 : i32
    %c0_i32_0 = arith.constant 0 : i32
    %c0_i32_1 = arith.constant 0 : i32
    return %c0_i32, %c0_i32_0 : i32, i32
  }
  func.func @transform_5(%arg0: i32) -> (i32, i32) {
    %c0_i32 = arith.constant 0 : i32
    %c0_i32_0 = arith.constant 0 : i32
    %c0_i32_1 = arith.constant 0 : i32
    return %c0_i32, %c0_i32_0 : i32, i32
  }
  func.func @transform_6(%arg0: i32) -> (i32, i32) {
    %c0_i32 = arith.constant 0 : i32
    %c0_i32_0 = arith.constant 0 : i32
    %c0_i32_1 = arith.constant 0 : i32
    return %c0_i32, %c0_i32_0 : i32, i32
  }
  func.func @transform_7(%arg0: i32) -> (i32, i32) {
    %c0_i32 = arith.constant 0 : i32
    %c0_i32_0 = arith.constant 0 : i32
    %c0_i32_1 = arith.constant 0 : i32
    return %c0_i32, %c0_i32_0 : i32, i32
  }
  func.func @transform_8(%arg0: i32) -> (i32, i32) {
    %c0_i32 = arith.constant 0 : i32
    %c0_i32_0 = arith.constant 0 : i32
    %c0_i32_1 = arith.constant 0 : i32
    return %c0_i32, %c0_i32_0 : i32, i32
  }
  func.func @transform_9(%arg0: i32) -> (i32, i32) {
    %c0_i32 = arith.constant 0 : i32
    %c0_i32_0 = arith.constant 0 : i32
    %c0_i32_1 = arith.constant 0 : i32
    return %c0_i32, %c0_i32_0 : i32, i32
  }
  func.func @transform_10(%arg0: i32) -> (i32, i32) {
    %c0_i32 = arith.constant 0 : i32
    %c0_i32_0 = arith.constant 0 : i32
    %c0_i32_1 = arith.constant 0 : i32
    return %c0_i32, %c0_i32_0 : i32, i32
  }
  func.func @transform_11(%arg0: i32) -> (i32, i32) {
    %c0_i32 = arith.constant 0 : i32
    %c0_i32_0 = arith.constant 0 : i32
    %c0_i32_1 = arith.constant 0 : i32
    return %c0_i32, %c0_i32_0 : i32, i32
  }
  func.func @transform_12(%arg0: i32) -> (i32, i32) {
    %c0_i32 = arith.constant 0 : i32
    %c0_i32_0 = arith.constant 0 : i32
    %c0_i32_1 = arith.constant 0 : i32
    return %c0_i32, %c0_i32_0 : i32, i32
  }
  func.func @transform_13(%arg0: i32) -> (i32, i32) {
    %c0_i32 = arith.constant 0 : i32
    %c0_i32_0 = arith.constant 0 : i32
    %c0_i32_1 = arith.constant 0 : i32
    return %c0_i32, %c0_i32_0 : i32, i32
  }
  func.func @transform_14(%arg0: i32) -> (i32, i32, i32) {
    %c0_i32 = arith.constant 0 : i32
    %c0_i32_0 = arith.constant 0 : i32
    %c0_i32_1 = arith.constant 0 : i32
    return %arg0, %c0_i32, %c0_i32_0 : i32, i32, i32
  }
}

</mosaic_0001>

<bundles_post_ra>
// kernel: tpu_custom_call.1
= control target key start
LH: loop header
LB: loop body
LE: loop exit
PB: predicated region body
PF: predicated region fallthrough
CT: control target
= control target key end

     0   :  { %s2631_s0 = inlined_call_operand.hbm [shape: f32[4,8,128], index: 0, kind: input, shape index: {}]   ;;  %s2632_s1 = inlined_call_operand.hbm [shape: f32[4,8,128], index: 1, kind: input, shape index: {}]   ;;  %s2633_s2 = inlined_call_operand.hbm [shape: bf16[128,256], index: 2, kind: input, shape index: {}]   ;;  %s2634_s3 = inlined_call_operand.hbm [shape: f32[1,256], index: 3, kind: input, shape index: {}]   ;;  %s2635_s4 = inlined_call_operand.hbm [shape: bf16[128,128], index: 4, kind: input, shape index: {}]   ;;  %s2636_s5 = inlined_call_operand.hbm [shape: f32[1,128], index: 5, kind: input, shape index: {}]   ;;  %s2637_s6 = inlined_call_operand.hbm [shape: bf16[128,256], index: 6, kind: input, shape index: {}]   ;;  %s2638_s7 = inlined_call_operand.hbm [shape: f32[1,256], index: 7, kind: input, shape index: {}]   ;;  %s2639_s8 = inlined_call_operand.vmem [shape: f32[1,512], index: 8, kind: input, shape index: {}]   ;;  %s2640_s9 = inlined_call_operand.vmem [shape: f32[1,512], index: 9, kind: input, shape index: {}]   ;;  %s2641_s10 = inlined_call_operand.hbm [shape: bf16[128,128], index: 10, kind: input, shape index: {}]   ;;  %s2642_s11 = inlined_call_operand.vmem [shape: f32[1,128], index: 11, kind: input, shape index: {}]   ;;  %s2643_s12 = inlined_call_operand.vmem [shape: f32[1,128], index: 12, kind: input, shape index: {}]   ;;  %s2644_s13 = inlined_call_operand.vmem [shape: f32[1,128], index: 13, kind: input, shape index: {}]   ;;  %s2645_s14 = inlined_call_operand.hbm [shape: f32[4,8,128], index: 14, kind: output, shape index: {}]  }
   0x1   :  { %2648 = sst [smem:[#allocation28_spill]] %s2633_s2 }
   0x2   :  { %2649 = sst [smem:[#allocation29_spill]] %s2634_s3 }
   0x3   :  { %2650 = sst [smem:[#allocation30_spill]] %s2635_s4 }
   0x4   :  { %2651 = sst [smem:[#allocation31_spill]] %s2636_s5 }
   0x5   :  { %2652 = sst [smem:[#allocation32_spill]] %s2637_s6 }
   0x6   :  { %2653 = sst [smem:[#allocation33_spill]] %s2638_s7 }
   0x7   :  { %2654 = sst [smem:[#allocation34_spill]] %s2641_s10 }
   0x8   :  { %2655 = sst [smem:[#allocation35_spill]] %s2642_s11 }
   0x9   :  { %2656 = sst [smem:[#allocation36_spill]] %s2643_s12 }
   0xa   :  { %2657 = sst [smem:[#allocation37_spill]] %s2644_s13 }
   0xb   :  { %2658 = sst [smem:[#allocation38_spill]] %s2645_s14 }
   0xc   :  { %19 = vsyncpa [#allocation4], 0 }
   0xd   :  { %21 = vsyncpa [#allocation4 + $0x1], 0 }
   0xe   :  { %22 = vsyncpa [#allocation7], 0 }
   0xf   :  { %24 = vsyncpa [#allocation7 + $0x1], 0 }
  0x10   :  { %25 = vsyncpa [#allocation10], 0 }
  0x11   :  { %26 = vsyncpa [#allocation13], 0 }
  0x12   :  { %27 = vsyncpa [#allocation16], 0 }
  0x13   :  { %28 = vsyncpa [#allocation5], 0 }
  0x14   :  { %30 = vsyncpa [#allocation5 + $0x1], 0  ;;  %s2336_s29 = smov 0   ;;  %s2338_s30 = smov 0  }
  0x15   :  { %s2340_s15 = smov 0   ;;  %s2342_s16 = smov 0  }
  0x16 LB: > { %2659 = sst [smem:[#allocation26_spill]] %s2243_s15  ;;  %s2360_s20 = sadd.s32 4294967295, %s2247_s16   ;;  %s2247_s16 = sphi %s2342_s16, %s2683_s16   ;;  %s2243_s15 = sphi %s2340_s15, %s2680_s15   ;;  %s2239_s30 = sphi %s2338_s30, %s2682_s30   ;;  %s2235_s29 = sphi %s2336_s29, %s2681_s29  }
  0x17   : > { %s2660_s2 = sld [smem:[#allocation28_spill]]  ;;  %p1470_p0 = scmp.ge.s32.totalorder %s2247_s16, 1 }
  0x18   : > { %p57_p1 = scmp.eq.s32.totalorder %s2360_s20, 0  ;;  %p371_p2 = scmp.lt.s32.totalorder %s2247_s16, 5 }
  0x19   : > { %s2249_s22 = smov [#allocation8]   ;;  %s2662_s3 = sld [smem:[#allocation29_spill]] }
  0x1a   : > { %p2365_p3 = pnand %p1470_p0, %p371_p2  ;;  %s384_s23 = sshll.u32 %s2249_s22, 4  ;;  %s385_s23 = int_to_ptr.vmem [resolvable:$true] %s384_s23 }
  0x1b   : > { %s2664_s5 = sld [smem:[#allocation31_spill]]  ;;  %s2250_s22 = smov [#allocation9]  }
  0x1c   : > { %p1774_p4 = pneg %p2365_p3  ;;  %s2251_s14 = smov 128  }
  0x1d   : > { %s382_s19 = sshll.u32 %s2660_s2, 4  ;;  %s399_s2 = sshll.u32 %s2250_s22, 4  ;;  %s383_s19 = int_to_ptr.hbm [resolvable:$true] %s382_s19  ;;  %s400_s2 = int_to_ptr.vmem [resolvable:$true] %s399_s2 }
  0x1e   : > { %p2376_p5 = pnand %p1774_p4, %p57_p1  ;;  %s2252_s13 = smov 8  }
  0x1f   : > { %s397_s26 = sshll.u32 %s2662_s3, 4  ;;  %s2665_s7 = sld [smem:[#allocation33_spill]]  ;;  %s398_s26 = int_to_ptr.hbm [resolvable:$true] %s397_s26 }
  0x20   : > { %1777 = dma.hbm_to_vmem [thread:$0]  (!%p2376_p5), %s383_s19, 2048, %s385_s23, [#allocation7], %s2251_s14, %s2251_s14, %s2252_s13  }
  0x21   : > { %s423_s18 = sshll.u32 %s2664_s5, 4  ;;  %s2253_s28 = smov [#allocation12]   ;;  %s424_s18 = int_to_ptr.hbm [resolvable:$true] %s423_s18 }
  0x22   : > { %1780 = dma.hbm_to_vmem [thread:$0]  (!%p2376_p5), %s398_s26, 32, %s400_s2, [#allocation10]  }
  0x23   : > { %s425_s17 = sshll.u32 %s2253_s28, 4  ;;  %s2254_s22 = smov [#allocation15]   ;;  %s426_s17 = int_to_ptr.vmem [resolvable:$true] %s425_s17 }
  0x24   : > { %1786 = dma.hbm_to_vmem [thread:$0]  (!%p2376_p5), %s424_s18, 16, %s426_s17, [#allocation13]  }
  0x25   : > { %s449_s3 = sshll.u32 %s2665_s7, 4  ;;  %s451_s5 = sshll.u32 %s2254_s22, 4  ;;  %s450_s3 = int_to_ptr.hbm [resolvable:$true] %s449_s3  ;;  %s452_s5 = int_to_ptr.vmem [resolvable:$true] %s451_s5 }
  0x26   : > { %s2666_s4 = sld [smem:[#allocation30_spill]]  ;;  %s2255_s2 = smov [#allocation11]  }
  0x27   : > { %1792 = dma.hbm_to_vmem [thread:$0]  (!%p2376_p5), %s450_s3, 32, %s452_s5, [#allocation16]  }
  0x28   : > { %s410_s23 = sshll.u32 %s2255_s2, 4  ;;  %s2667_s6 = sld [smem:[#allocation32_spill]]  ;;  %s411_s23 = int_to_ptr.vmem [resolvable:$true] %s410_s23 }
  0x29   : > { %s2256_s25 = smov 64   ;;  %s2257_s28 = smov 4  }
  0x2a   : > { %s2258_s3 = smov [#allocation14]   ;;  %s2668_s10 = sld [smem:[#allocation34_spill]] }
  0x2b   : > { %s436_s5 = sshll.u32 %s2258_s3, 4  ;;  %s2259_s22 = smov [#allocation17]   ;;  %s437_s5 = int_to_ptr.vmem [resolvable:$true] %s436_s5 }
  0x2c   : > { %s408_s19 = sshll.u32 %s2666_s4, 4  ;;  %s1469_s2 = sadd.s32 4294967294, %s2247_s16   ;;  %s409_s19 = int_to_ptr.hbm [resolvable:$true] %s408_s19 }
  0x2d   : > { %1783 = dma.hbm_to_vmem [thread:$0]  (!%p2376_p5), %s409_s19, 1024, %s411_s23, [#allocation10], %s2256_s25, %s2256_s25, %s2257_s28  }
  0x2e   : > { %s434_s18 = sshll.u32 %s2667_s6, 4  ;;  %s468_s19 = sshll.u32 %s2259_s22, 4  ;;  %s435_s18 = int_to_ptr.hbm [resolvable:$true] %s434_s18  ;;  %s469_s19 = int_to_ptr.vmem [resolvable:$true] %s468_s19 }
  0x2f   : > { %1789 = dma.hbm_to_vmem [thread:$0]  (!%p2376_p5), %s435_s18, 2048, %s437_s5, [#allocation13], %s2251_s14, %s2251_s14, %s2252_s13  }
  0x30   : > { %s466_s17 = sshll.u32 %s2668_s10, 4  ;;  %s2417_s23 = sadd.s32 1, %s2247_s16   ;;  %s467_s17 = int_to_ptr.hbm [resolvable:$true] %s466_s17 }
  0x31   : > { %1795 = dma.hbm_to_vmem [thread:$0]  (!%p2376_p5), %s467_s17, 1024, %s469_s19, [#allocation16], %s2256_s25, %s2256_s25, %s2257_s28  }
  0x32   : > { %s43_s26 = sadd.s32 1, %s2243_s15  ;;  %s40_s24 = ssub.s32 %s2247_s16, %s2417_s23 }
  0x33   : > { %p50_p6 = scmp.ne.s32.totalorder %s2243_s15, %s2239_s30  ;;  %p41_p7 = scmp.eq.s32.totalorder %s40_s24, 0 }
  0x34   : > { %p51_p8 = scmp.eq.s32.totalorder %s2247_s16, 0  ;;  %p56_p9 = scmp.ne.s32.totalorder %s2239_s30, %s2235_s29 }
  0x35   : > { %p358_p10 = scmp.eq.s32.totalorder %s2360_s20, 3  ;;  %p364_p0 = scmp.eq.s32.totalorder %s1469_s2, 3 }
  0x36   : > { %s2429_s13 = scalar_select %p41_p7, %s2243_s15, %s43_s26  }
  0x37   : > { %p2431_p11 = por %p51_p8, %p50_p6  ;;  %p2437_p12 = por %p57_p1, %p56_p9 }
  0x38   : > { %2669 = sst [smem:[#allocation27_spill]] %s2429_s13  ;;  %p2441_p13 = por %p358_p10, %p50_p6 }
  0x39   : > { %p1814_p2 = scmp.lt.s32.totalorder %s2247_s16, 4  ;;  %s491_s25 = sand.u32 1, %s2243_s15  }
  0x3a   : > { %p2447_p4 = por %p364_p0, %p56_p9  ;;  %s1479_s3 = sshll.u32 %s491_s25, 3 }
  0x3b   : > { %s1480_s5 = sshll.u32 %s2247_s16, 3  ;;  %s495_s19 = scalar_lea.vmem [#allocation3], %s1479_s3 }
  0x3c   : > { %s499_s17 = scalar_lea.hbm %s2631_s0, %s1480_s5  ;;  %s503_s26 = sshll.u32 %s495_s19, 4  ;;  %s504_s26 = int_to_ptr.vmem [resolvable:$true] %s503_s26 }
  0x3d   : > { %s501_s22 = sshll.u32 %s499_s17, 4  ;;  %p2457_p5 = pnand %p1814_p2, %p2431_p11  ;;  %s502_s22 = int_to_ptr.hbm [resolvable:$true] %s501_s22 }
  0x3e   : > { %s518_s6 = scalar_lea.hbm %s2632_s1, %s1480_s5  ;;  %s510_s7 = sand.u32 1, %s2247_s16  }
  0x3f   : > { %s492_s10 = scalar_lea.sflag [#allocation4], %s491_s25  ;;  %s2101_s11 = sshra.s32 %s502_s22, 4  ;;  %s2102_s11 = int_to_ptr.hbm [resolvable:$true] %s2101_s11 }
  0x40   : > { %s2103_s12 = scalar_lea.hbm %s2102_s11, 8  ;;  %p2105_p7 = pneg %p2457_p5 }
  0x41   : > { %p2104_p6 = scmp.ne.s32.totalorder %s2102_s11, %s2103_s12  ;;  %s2108_s19 = scalar_lea.hbm %s2631_s0, 32 }
  0x42   : > { %p2109_p10 = scmp.lt.s32.totalorder %s2102_s11, %s2631_s0  ;;  %p2110_p11 = scmp.lt.s32.totalorder %s2108_s19, %s2103_s12 }
  0x43   : > { %p2106_p8 = pnand %p2105_p7, %p2104_p6 }
  0x44   : > { %p2111_p0 = por %p2110_p11, %p2109_p10 }
  0x45   : > { %p2107_p9 = pneg %p2106_p8 }
  0x47   : > { %p2112_p2 = pnand %p2111_p0, %p2107_p9 }
  0x49   : > { %2115 = shalt.err (!%p2112_p2)
}
  0x4a   : > { %1799 = dma.hbm_to_vmem [thread:$0]  (!%p2457_p5), %s502_s22, 128, %s504_s26, %s492_s10  }
  0x4b   : > { %s520_s25 = sshll.u32 %s518_s6, 4  ;;  %s514_s5 = scalar_lea.vmem [#allocation6], %s1479_s3  ;;  %s521_s25 = int_to_ptr.hbm [resolvable:$true] %s520_s25 }
  0x4c   : > { %s522_s13 = sshll.u32 %s514_s5, 4  ;;  %s511_s15 = scalar_lea.sflag [#allocation7], %s510_s7  ;;  %s523_s13 = int_to_ptr.vmem [resolvable:$true] %s522_s13 }
  0x4d   : > { %s2131_s14 = sshra.s32 %s521_s25, 4  ;;  %s2138_s19 = scalar_lea.hbm %s2632_s1, 32  ;;  %s2132_s14 = int_to_ptr.hbm [resolvable:$true] %s2131_s14 }
  0x4e   : > { %s2133_s17 = scalar_lea.hbm %s2132_s14, 8  ;;  %p2139_p9 = scmp.lt.s32.totalorder %s2132_s14, %s2632_s1 }
  0x4f   : > { %p2134_p6 = scmp.ne.s32.totalorder %s2132_s14, %s2133_s17  ;;  %p2140_p11 = scmp.lt.s32.totalorder %s2138_s19, %s2133_s17 }
  0x51   : > { %p2136_p8 = pnand %p2134_p6, %p2105_p7  ;;  %p2141_p0 = por %p2140_p11, %p2139_p9 }
  0x53   : > { %p2137_p10 = pneg %p2136_p8 }
  0x55   : > { %p2142_p2 = pnand %p2141_p0, %p2137_p10 }
  0x57   : > { %2145 = shalt.err (!%p2142_p2)
}
  0x58   : > { %1802 = dma.hbm_to_vmem [thread:$0]  (!%p2457_p5), %s521_s25, 128, %s523_s13, %s511_s15  }
  0x59   : > { %531 = sbr.rel (%p2365_p3) target bundleno = 694 (0x2b6), region = 76  ;;  %s2492_s6 = sand.u32 (!%p2365_p3), 1, %s2239_s30  }
  0x5a   : > { %s2495_s7 = sshll.u32 (!%p2365_p3), %s2492_s6, 3  ;;  %s534_s3 = scalar_lea.sflag (!%p2365_p3), [#allocation4], %s2492_s6 }
  0x5b   : > { %s537_s22 = scalar_lea.vmem (!%p2365_p3), [#allocation3], %s2495_s7 }
  0x5e   : > { %2206 = dma.done.wait (%p2437_p12), %s534_s3, 128  }
  0x5f   : > { %2208 = vsyncadd (%p2437_p12), %s534_s3, 4294967168  ;;  %s543_s15 = sand.u32 1, %s2360_s20   ;;  %s547_s13 = scalar_lea.vmem [#allocation6], %s2495_s7 }
  0x60   : > { %s544_s21 = scalar_lea.sflag [#allocation7], %s543_s15 }
  0x61   : > { %2210 = dma.done.wait (%p2437_p12), %s544_s21, 128  }
  0x62   : > { %2212 = vsyncadd (%p2437_p12), %s544_s21, 4294967168 }
  0x63   : > { %2214 = dma.done.wait (%p57_p1), [#allocation7], 2048  }
  0x64   : > { %2216 = vsyncadd (%p57_p1), [#allocation7], 4294965248 }
  0x65   : > { %2218 = dma.done.wait (%p57_p1), [#allocation10], 1056  }
  0x66   : > { %2220 = vsyncadd (%p57_p1), [#allocation10], 4294966240 }
  0x67   : > { %2222 = dma.done.wait (%p57_p1), [#allocation13], 2064  }
  0x68   : > { %2224 = vsyncadd (%p57_p1), [#allocation13], 4294965232 }
  0x69   : > { %2226 = dma.done.wait (%p57_p1), [#allocation16], 1056  }
  0x6a   : > { %2228 = vsyncadd (%p57_p1), [#allocation16], 4294966240  ;;  %v1552_v0 = vld [vmem:[#allocation8 + $0x70] sm:$0xf]  ;;  %v1707_v1 = vld [vmem:[#allocation8 + $0x74] sm:$0xf0] }
  0x6b   : > { %v1715_v2 = vld [vmem:[#allocation11 + $0x38] sm:$0xff]  ;;  %v1553_v3 = vor.u32 %v1707_v1, %v1552_v0  ;;  %v1705_v5 = vld [vmem:[#allocation8 + $0x64] sm:$0xf0]  ;;  %v1714_v6 = vld [vmem:[#allocation11 + $0x30] sm:$0xff]  ;;  %s2675_s14 = sld [smem:[#allocation35_spill]]  ;;  %s1689_s17 = sshll.u32 %s2360_s20, 3 }
  0x6c   : > { %v1544_v4 = vld [vmem:[#allocation8 + $0x60] sm:$0xf]  ;;  %833 = vmatpush.bf16.msra.mxu2 %v1715_v2  ;;  %v1536_v8 = vld [vmem:[#allocation8 + $0x50] sm:$0xf]  ;;  %v1703_v9 = vld [vmem:[#allocation8 + $0x54] sm:$0xf0] }
  0x6d   : > { %738 = vmatpush.bf16.msra.mxu0 %v1553_v3  ;;  %v1545_v7 = vor.u32 %v1705_v5, %v1544_v4  ;;  %v1713_v10 = vld [vmem:[#allocation11 + $0x28] sm:$0xff]  ;;  %v1537_v11 = vor.u32 %v1703_v9, %v1536_v8  ;;  %v1528_v12 = vld [vmem:[#allocation8 + $0x40] sm:$0xf]  ;;  %v1706_v14 = vld [vmem:[#allocation8 + $0x74] sm:$0xf]  ;;  %s2676_s19 = sld [smem:[#allocation36_spill]] }
  0x6e   : > { %v1701_v13 = vld [vmem:[#allocation8 + $0x44] sm:$0xf0]  ;;  %v1554_v15 = vld [vmem:[#allocation8 + $0x78] sm:$0xf0]  ;;  %v1704_v16 = vld [vmem:[#allocation8 + $0x64] sm:$0xf] }
  0x6f   : > { %v1546_v17 = vld [vmem:[#allocation8 + $0x68] sm:$0xf0]  ;;  %v1712_v18 = vld [vmem:[#allocation11 + $0x20] sm:$0xff]  ;;  %v1557_v19 = vor.u32 %v1706_v14, %v1554_v15  ;;  %v1529_v20 = vor.u32 %v1701_v13, %v1528_v12  ;;  %v1520_v21 = vld [vmem:[#allocation8 + $0x30] sm:$0xf]  ;;  %s2677_s3 = sld [smem:[#allocation37_spill]] }
  0x70   : > { %834 = vmatpush.bf16.msra.mxu2 %v1714_v6  ;;  %v1699_v22 = vld [vmem:[#allocation8 + $0x34] sm:$0xf0]  ;;  %v1549_v23 = vor.u32 %v1704_v16, %v1546_v17  ;;  %v1648_v24 = vld [vmem:[#allocation14 + $0x70] sm:$0xf]  ;;  %v1731_v25 = vld [vmem:[#allocation14 + $0x74] sm:$0xf0] }
  0x71   : > { %739 = vmatpush.bf16.msra.mxu0 %v1545_v7  ;;  %751 = vmatpush.bf16.msra.mxu1 %v1557_v19  ;;  %v1702_v26 = vld [vmem:[#allocation8 + $0x54] sm:$0xf]  ;;  %v1538_v27 = vld [vmem:[#allocation8 + $0x58] sm:$0xf0]  ;;  %v1649_v28 = vor.u32 %v1731_v25, %v1648_v24  ;;  %v1640_v30 = vld [vmem:[#allocation14 + $0x60] sm:$0xf]  ;;  %v1521_v32 = vor.u32 %v1699_v22, %v1520_v21 }
  0x72   : > { %v1711_v29 = vld [vmem:[#allocation11 + $0x18] sm:$0xff]  ;;  %v1729_v31 = vld [vmem:[#allocation14 + $0x64] sm:$0xf0]  ;;  %v1697_v35 = vld [vmem:[#allocation8 + $0x24] sm:$0xf0]  ;;  %v1541_v36 = vor.u32 %v1702_v26, %v1538_v27  ;;  %s2678_s21 = sld [smem:[#allocation38_spill]] }
  0x73   : > { %v1512_v33 = vld [vmem:[#allocation8 + $0x20] sm:$0xf]  ;;  %950 = vmatpush.bf16.msra.mxu3 %v1649_v28  ;;  %v1641_v34 = vor.u32 %v1729_v31, %v1640_v30  ;;  %v1632_v37 = vld [vmem:[#allocation14 + $0x50] sm:$0xf]  ;;  %v1727_v38 = vld [vmem:[#allocation14 + $0x54] sm:$0xf0] }
  0x74   : > { %835 = vmatpush.bf16.msra.mxu2 %v1713_v10  ;;  %v1700_v39 = vld [vmem:[#allocation8 + $0x44] sm:$0xf]  ;;  %v1530_v40 = vld [vmem:[#allocation8 + $0x48] sm:$0xf0]  ;;  %v1710_v41 = vld [vmem:[#allocation11 + $0x10] sm:$0xff]  ;;  %v1513_v42 = vor.u32 %v1697_v35, %v1512_v33  ;;  %v1633_v45 = vor.u32 %v1727_v38, %v1632_v37  ;;  %s632_s27 = scalar_lea.vmem [#allocation18], %s2495_s7 }
  0x75   : > { %740 = vmatpush.bf16.msra.mxu0 %v1537_v11  ;;  %752 = vmatpush.bf16.msra.mxu1 %v1549_v23  ;;  %v1504_v43 = vld [vmem:[#allocation8 + $0x10] sm:$0xf]  ;;  %v1695_v44 = vld [vmem:[#allocation8 + $0x14] sm:$0xf0]  ;;  %v1533_v46 = vor.u32 %v1700_v39, %v1530_v40  ;;  %v1698_v47 = vld [vmem:[#allocation8 + $0x34] sm:$0xf] }
  0x76   : > { %v1624_v48 = vld [vmem:[#allocation14 + $0x40] sm:$0xf]  ;;  %v1725_v49 = vld [vmem:[#allocation14 + $0x44] sm:$0xf0]  ;;  %v1522_v50 = vld [vmem:[#allocation8 + $0x38] sm:$0xf0]  ;;  %v1505_v52 = vor.u32 %v1695_v44, %v1504_v43 }
  0x77   : > { %951 = vmatpush.bf16.msra.mxu3 %v1641_v34  ;;  %v1709_v51 = vld [vmem:[#allocation11 + $0x8] sm:$0xff]  ;;  %v1496_v53 = vld [vmem:[#allocation8] sm:$0xf]  ;;  %v1625_v55 = vor.u32 %v1725_v49, %v1624_v48  ;;  %v1525_v56 = vor.u32 %v1698_v47, %v1522_v50  ;;  %v1730_v57 = vld [vmem:[#allocation14 + $0x74] sm:$0xf]  ;;  %s1307_s20 = sshll.u32 %s632_s27, 4  ;;  %s1308_s20 = int_to_ptr.vmem [resolvable:$true] %s1307_s20 }
  0x78   : > { %836 = vmatpush.bf16.msra.mxu2 %v1712_v18  ;;  %v1693_v54 = vld [vmem:[#allocation8 + $0x4] sm:$0xf0]  ;;  %v1616_v58 = vld [vmem:[#allocation14 + $0x30] sm:$0xf]  ;;  %v1723_v59 = vld [vmem:[#allocation14 + $0x34] sm:$0xf0] }
  0x79   : > { %741 = vmatpush.bf16.msra.mxu0 %v1529_v20  ;;  %753 = vmatpush.bf16.msra.mxu1 %v1541_v36  ;;  %v1650_v60 = vld [vmem:[#allocation14 + $0x78] sm:$0xf0]  ;;  %v1696_v61 = vld [vmem:[#allocation8 + $0x24] sm:$0xf]  ;;  %v1514_v62 = vld [vmem:[#allocation8 + $0x28] sm:$0xf0]  ;;  %v1497_v1 = vor.u32 %v1693_v54, %v1496_v53  ;;  %v1617_v3 = vor.u32 %v1723_v59, %v1616_v58 }
  0x7a   : > { %v1708_v63 = vld [vmem:[#allocation11] sm:$0xff]  ;;  %v634_v2 = vld [vmem:[%s547_s13] sm:$0xff]  ;;  %v1653_v4 = vor.u32 %v1730_v57, %v1650_v60  ;;  %v1517_v5 = vor.u32 %v1696_v61, %v1514_v62  ;;  %v1498_v17 = vld [vmem:[#allocation8 + $0x8] sm:$0xf0]  ;;  %v2260_v58 = vmov 8.0   ;;  %s1305_s13 = scalar_lea.hbm %s2678_s21, %s1689_s17  ;;  %s1295_s2 = scalar_lea.sflag [#allocation5], %s2492_s6 }
  0x7b   : > { %952 = vmatpush.bf16.msra.mxu3 %v1633_v45  ;;  %v633_v0 = vld [vmem:[%s537_s22] sm:$0xff]  ;;  %v1642_v8 = vld [vmem:[#allocation14 + $0x68] sm:$0xf0]  ;;  %v1694_v9 = vld [vmem:[#allocation8 + $0x14] sm:$0xf]  ;;  %v635_v11 = vpack.c.bf16 %v634_v2, %v634_v2  ;;  %1871 = vrcp.f32 %v2260_v58  ;;  %s1309_s26 = sshll.u32 %s1305_s13, 4  ;;  %s1310_s26 = int_to_ptr.hbm [resolvable:$true] %s1309_s26 }
  0x7c   : > { %837 = vmatpush.bf16.msra.mxu2 %v1711_v29  ;;  %v1728_v6 = vld [vmem:[#allocation14 + $0x64] sm:$0xf]  ;;  %v764_v7 = vpack.c.bf16 %v633_v0, %v633_v0  ;;  %v1506_v10 = vld [vmem:[#allocation8 + $0x18] sm:$0xf0]  ;;  %v1726_v14 = vld [vmem:[#allocation14 + $0x54] sm:$0xf] }
  0x7d   : > { %742 = vmatpush.bf16.msra.mxu0 %v1521_v32  ;;  %754 = vmatpush.bf16.msra.mxu1 %v1533_v46  ;;  %v1645_v12 = vor.u32 %v1728_v6, %v1642_v8  ;;  %v1509_v13 = vor.u32 %v1694_v9, %v1506_v10  ;;  %v1634_v15 = vld [vmem:[#allocation14 + $0x58] sm:$0xf0]  ;;  %v1692_v16 = vld [vmem:[#allocation8 + $0x4] sm:$0xf]  ;;  %v1724_v20 = vld [vmem:[#allocation14 + $0x44] sm:$0xf] }
  0x7e   : > { %v1637_v18 = vor.u32 %v1726_v14, %v1634_v15  ;;  %v1501_v19 = vor.u32 %v1692_v16, %v1498_v17  ;;  %v1626_v21 = vld [vmem:[#allocation14 + $0x48] sm:$0xf0]  ;;  %v1722_v23 = vld [vmem:[#allocation14 + $0x34] sm:$0xf]  ;;  %v1618_v24 = vld [vmem:[#allocation14 + $0x38] sm:$0xf0] }
  0x7f   : > { %953 = vmatpush.bf16.msra.mxu3 %v1625_v55  ;;  %v1629_v22 = vor.u32 %v1724_v20, %v1626_v21  ;;  %v1621_v25 = vor.u32 %v1722_v23, %v1618_v24  ;;  %v1608_v26 = vld [vmem:[#allocation14 + $0x20] sm:$0xf]  ;;  %v1721_v27 = vld [vmem:[#allocation14 + $0x24] sm:$0xf0]  ;;  %v1720_v28 = vld [vmem:[#allocation14 + $0x24] sm:$0xf] }
  0x80   : > { %838 = vmatpush.bf16.msra.mxu2 %v1710_v41  ;;  %v1609_v29 = vor.u32 %v1721_v27, %v1608_v26  ;;  %v1610_v30 = vld [vmem:[#allocation14 + $0x28] sm:$0xf0]  ;;  %v1600_v32 = vld [vmem:[#allocation14 + $0x10] sm:$0xf]  ;;  %v1719_v33 = vld [vmem:[#allocation14 + $0x14] sm:$0xf0] }
  0x81   : > { %743 = vmatpush.bf16.msra.mxu0 %v1513_v42  ;;  %755 = vmatpush.bf16.msra.mxu1 %v1525_v56  ;;  %v1613_v31 = vor.u32 %v1720_v28, %v1610_v30  ;;  %v1718_v34 = vld [vmem:[#allocation14 + $0x14] sm:$0xf]  ;;  %v1601_v35 = vor.u32 %v1719_v33, %v1600_v32  ;;  %v1602_v36 = vld [vmem:[#allocation14 + $0x18] sm:$0xf0]  ;;  %v1592_v38 = vld [vmem:[#allocation14] sm:$0xf]  ;;  %v1872_v62 = vpop.eup %1871 }
  0x82   : > { %v1605_v37 = vor.u32 %v1718_v34, %v1602_v36  ;;  %v1717_v39 = vld [vmem:[#allocation14 + $0x4] sm:$0xf0]  ;;  %v1716_v40 = vld [vmem:[#allocation14 + $0x4] sm:$0xf]  ;;  %v1594_v42 = vld [vmem:[#allocation14 + $0x8] sm:$0xf0]  ;;  %vm1013_vm0 = vweird.f32 %v1872_v62 }
  0x83   : > { %954 = vmatpush.bf16.msra.mxu3 %v1617_v3  ;;  %v1593_v41 = vor.u32 %v1717_v39, %v1592_v38  ;;  %v1597_v43 = vor.u32 %v1716_v40, %v1594_v42  ;;  %v652_v44 = vld [vmem:[#allocation9] sm:$0x3]  ;;  %v1867_v47 = vld [vmem:[#allocation12] ss:$0 sm:$0xff]  ;;  %v1009_v0 = vmul.f32 8.0, %v1872_v62  ;;  %s2175_s24 = sshra.s32 %s1310_s26, 4  ;;  %s2176_s24 = int_to_ptr.hbm [resolvable:$true] %s2175_s24 }
  0x84   : > { %839 = vmatpush.bf16.msra.mxu2 %v1709_v51  ;;  %v654_v45 = vperm.slane %v652_v44, 0  ;;  %v655_v57 = vperm.slane %v652_v44, 1  ;;  %s2177_s25 = scalar_lea.hbm %s2176_s24, 8  ;;  %s2181_s17 = scalar_lea.hbm %s2678_s21, 32 }
  0x85   : > { %744 = vmatpush.bf16.msra.mxu0 %v1505_v52  ;;  %756 = vmatpush.bf16.msra.mxu1 %v1517_v5  ;;  %v1010_v3 = vsub.f32 1.0, %v1009_v0  ;;  %v864_v5 = vld [vmem:[#allocation15] sm:$0x3]  ;;  %p2178_p1 = scmp.ne.s32.totalorder %s2176_s24, %s2177_s25  ;;  %p2182_p5 = scmp.lt.s32.totalorder %s2176_s24, %s2678_s21 }
  0x86   : > { %v867_v9 = vperm.slane %v864_v5, 1  ;;  %v866_v17 = vperm.slane %v864_v5, 0  ;;  %p2183_p7 = scmp.lt.s32.totalorder %s2181_s17, %s2177_s25 }
  0x87   : > { %955 = vmatpush.bf16.msra.mxu3 %v1609_v29  ;;  %p2179_p3 = pnand %p2178_p1, %p2441_p13 }
  0x88   : > { %840 = vmatpush.bf16.msra.mxu2 %v1708_v63  ;;  %p2184_p6 = por %p2183_p7, %p2182_p5 }
  0x89   : > { %745 = vmatpush.bf16.msra.mxu0 %v1497_v1  ;;  %757 = vmatpush.bf16.msra.mxu1 %v1509_v13  ;;  %p2180_p12 = pneg %p2179_p3 }
  0x8b   : > { %841 = vmatmul.bf16.vlgmr.msra.gmra.mxu2 %v764_v7  ;;  %956 = vmatpush.bf16.msra.mxu3 %v1601_v35  ;;  %v1011_v7 = vmul.f32 %v1872_v62, %v1010_v3  ;;  %p2185_p8 = pnand %p2184_p6, %p2180_p12 }
  0x8c   : > { %746 = vmatmul.bf16.vlgmr.msra.gmra.mxu0 %v635_v11 }
  0x8d   : > { %963 = vmatpush.bf16.msrb.mxu0 %v1653_v4  ;;  %758 = vmatpush.bf16.msra.mxu1 %v1501_v19 }
  0x8f   : > { %957 = vmatpush.bf16.msra.mxu3 %v1593_v41 }
  0x90   : > { %759 = vmatmul.bf16.vlgmr.msra.gmra.mxu1 %v635_v11  ;;  %v1012_v11 = vadd.f32 %v1872_v62, %v1011_v7 }
  0x91   : > { %964 = vmatpush.bf16.msrb.mxu0 %v1645_v12 }
  0x95   : > { %965 = vmatpush.bf16.msrb.mxu0 %v1637_v18  ;;  %v2529_v18 = vsel %vm1013_vm0, %v1872_v62, %v1012_v11  ;;  %v1738_v11 = vld [vmem:[#allocation17 + $0x30] sm:$0xff] }
  0x99   : > { %966 = vmatpush.bf16.msrb.mxu0 %v1629_v22 }
  0x9d   : > { %967 = vmatpush.bf16.msrb.mxu0 %v1621_v25 }
  0xa1   : > { %968 = vmatpush.bf16.msrb.mxu0 %v1613_v31 }
  0xa5   : > { %969 = vmatpush.bf16.msrb.mxu0 %v1605_v37 }
  0xa9   : > { %970 = vmatpush.bf16.msrb.mxu0 %v1597_v43 }
 0x109   : > { %v747_v46 = vpop.f32.mrf.mxu0 }
 0x10a   : > { %v748_v48 = vadd.f32 %v747_v46, %v654_v45 }
 0x10d   : > { %v760_v55 = vpop.f32.mrf.mxu1 }
 0x10e   : > { %v842_v49 = vpop.f32.mrf.mxu2  ;;  %v761_v59 = vadd.f32 %v760_v55, %v655_v57 }
 0x10f   : > { %v843_v50 = vadd.f32 %v1867_v47, %v842_v49 }
 0x110   : > { %v1002_v61 = vrot.slane %v761_v59, 4 }
 0x111   : > { %v749_v51 = vpop.f32.mrf.mxu0  ;;  %v846_v52 = vmul.f32 %v843_v50, %v748_v48  ;;  %v996_v60 = vrot.slane %v843_v50, 4 }
 0x112   : > { %v1003_v1 = vadd.f32 %v1002_v61, %v761_v59 }
 0x113   : > { %v847_v53 = vpack.c.bf16 %v846_v52, %v846_v52  ;;  %v997_v63 = vadd.f32 %v996_v60, %v843_v50 }
 0x114   : > { %v1004_v4 = vrot.slane %v1003_v1, 2 }
 0x115   : > { %958 = vmatmul.bf16.vlgmr.msra.gmra.mxu3 %v847_v53  ;;  %971 = vmatmul.bf16.vlgmr.msrb.gmra.mxu0 %v847_v53  ;;  %v762_v56 = vpop.f32.mrf.mxu1  ;;  %v998_v2 = vrot.slane %v997_v63, 2 }
 0x116   : > { %v844_v54 = vpop.f32.mrf.mxu2  ;;  %v1005_v8 = vadd.f32 %v1004_v4, %v1003_v1 }
 0x117   : > { %v999_v6 = vadd.f32 %v998_v2, %v997_v63 }
 0x118   : > { %v1006_v12 = vrot.slane %v1005_v8, 1 }
 0x119   : > { %v1000_v10 = vrot.slane %v999_v6, 1 }
 0x11a   : > { %v1007_v19 = vadd.f32 %v1006_v12, %v1005_v8 }
 0x11b   : > { %v1001_v15 = vadd.f32 %v1000_v10, %v999_v6  ;;  %v1739_v6 = vld [vmem:[#allocation17 + $0x38] sm:$0xff] }
 0x11c   : > { %v1018_v25 = vmul.f32 %v2529_v18, %v1007_v19  ;;  %1241 = vmatpush.bf16.msrb.mxu1 %v1739_v6 }
 0x11d   : > { %v1017_v22 = vmul.f32 %v2529_v18, %v1001_v15 }
 0x11e   : > { %v2535_v32 = vsub.f32 %v761_v59, %v1018_v25 }
 0x11f   : > { %v2533_v29 = vsub.f32 %v843_v50, %v1017_v22 }
 0x120   : > { %v1026_v39 = vmul.f32 %v2535_v32, %v2535_v32  ;;  %1242 = vmatpush.bf16.msrb.mxu1 %v1738_v11 }
 0x121   : > { %v1025_v36 = vmul.f32 %v2533_v29, %v2533_v29 }
 0x122   : > { %v1045_v45 = vrot.slane %v1026_v39, 4 }
 0x123   : > { %v1039_v42 = vrot.slane %v1025_v36, 4 }
 0x124   : > { %v1046_v51 = vadd.f32 %v1045_v45, %v1026_v39 }
 0x125   : > { %v1040_v48 = vadd.f32 %v1039_v42, %v1025_v36 }
 0x126   : > { %v1047_v57 = vrot.slane %v1046_v51, 2 }
 0x127   : > { %v1041_v54 = vrot.slane %v1040_v48, 2 }
 0x128   : > { %v1048_v63 = vadd.f32 %v1047_v57, %v1046_v51 }
 0x129   : > { %v1042_v60 = vadd.f32 %v1041_v54, %v1040_v48 }
 0x12a   : > { %v1049_v5 = vrot.slane %v1048_v63, 1 }
 0x12b   : > { %v1043_v2 = vrot.slane %v1042_v60, 1 }
 0x12c   : > { %v1050_v10 = vadd.f32 %v1049_v5, %v1048_v63 }
 0x12d   : > { %v1044_v8 = vadd.f32 %v1043_v2, %v1042_v60 }
 0x12e   : > { %v1054_v15 = vmul.f32 %v1050_v10, %v2529_v18 }
 0x130   : > { %v2557_v22 = vadd.f32 1e-05, %v1054_v15 }
 0x132   : > { %vm1095_vm7 = vweird.f32 %v2557_v22 }
 0x192   : > { %v972_v13 = vpop.f32.mrf.mxu0 }
 0x193   : > { %v973_v14 = vadd.f32 %v972_v13, %v867_v9 }
 0x195   : > { %v990_v16 = vrot.slane %v973_v14, 4 }
 0x197   : > { %v991_v20 = vadd.f32 %v990_v16, %v973_v14 }
 0x198   : > { %v959_v21 = vpop.f32.mrf.mxu3 }
 0x199   : > { %v992_v23 = vrot.slane %v991_v20, 2  ;;  %v960_v24 = vadd.f32 %v959_v21, %v866_v17  ;;  %v1737_v17 = vld [vmem:[#allocation17 + $0x28] sm:$0xff] }
 0x19a   : > { %v974_v26 = vpop.f32.mrf.mxu0  ;;  %1243 = vmatpush.bf16.msrb.mxu1 %v1737_v17 }
 0x19b   : > { %v993_v27 = vadd.f32 %v992_v23, %v991_v20  ;;  %v984_v28 = vrot.slane %v960_v24, 4  ;;  %v1736_v20 = vld [vmem:[#allocation17 + $0x20] sm:$0xff] }
 0x19d   : > { %v994_v30 = vrot.slane %v993_v27, 1  ;;  %v985_v31 = vadd.f32 %v984_v28, %v960_v24  ;;  %v2564_v28 = vld [vmem:[%s2639_s8] sm:$0xf] }
 0x19e   : > { %1244 = vmatpush.bf16.msrb.mxu1 %v1736_v20  ;;  %v1105_v48 = vperm.slane %v2564_v28, 0  ;;  %v1108_v15 = vperm.slane %v2564_v28, 3 }
 0x19f   : > { %v995_v33 = vadd.f32 %v994_v30, %v993_v27  ;;  %v986_v34 = vrot.slane %v985_v31, 2  ;;  %v1735_v27 = vld [vmem:[#allocation17 + $0x18] sm:$0xff] }
 0x1a0   : > { %v961_v35 = vpop.f32.mrf.mxu3 }
 0x1a1   : > { %v1016_v37 = vmul.f32 %v2529_v18, %v995_v33  ;;  %v987_v38 = vadd.f32 %v986_v34, %v985_v31  ;;  %v1106_v33 = vperm.slane %v2564_v28, 1  ;;  %v2570_v35 = vld [vmem:[%s2640_s9] sm:$0xf] }
 0x1a2   : > { %1245 = vmatpush.bf16.msrb.mxu1 %v1735_v27  ;;  %v1120_v39 = vperm.slane %v2570_v35, 1  ;;  %v1119_v54 = vperm.slane %v2570_v35, 0 }
 0x1a3   : > { %v2542_v40 = vsub.f32 %v973_v14, %v1016_v37  ;;  %v988_v41 = vrot.slane %v987_v38, 1  ;;  %v1053_v14 = vmul.f32 %v1044_v8, %v2529_v18  ;;  %v1734_v37 = vld [vmem:[#allocation17 + $0x10] sm:$0xff] }
 0x1a5   : > { %v1024_v43 = vmul.f32 %v2542_v40, %v2542_v40  ;;  %v989_v44 = vadd.f32 %v988_v41, %v987_v38  ;;  %v2555_v21 = vadd.f32 1e-05, %v1053_v14 }
 0x1a6   : > { %1246 = vmatpush.bf16.msrb.mxu1 %v1734_v37 }
 0x1a7   : > { %v1033_v46 = vrot.slane %v1024_v43, 4  ;;  %v1015_v47 = vmul.f32 %v2529_v18, %v989_v44  ;;  %vm1085_vm11 = vweird.f32 %v2555_v21 }
 0x1a9   : > { %v1034_v49 = vadd.f32 %v1033_v46, %v1024_v43  ;;  %v2547_v50 = vsub.f32 %v960_v24, %v1015_v47  ;;  %v1733_v46 = vld [vmem:[#allocation17 + $0x8] sm:$0xff] }
 0x1aa   : > { %1247 = vmatpush.bf16.msrb.mxu1 %v1733_v46 }
 0x1ab   : > { %v1035_v52 = vrot.slane %v1034_v49, 2  ;;  %v1023_v53 = vmul.f32 %v2547_v50, %v2547_v50 }
 0x1ad   : > { %v1036_v55 = vadd.f32 %v1035_v52, %v1034_v49  ;;  %v1027_v56 = vrot.slane %v1023_v53, 4 }
 0x1af   : > { %v1037_v58 = vrot.slane %v1036_v55, 1  ;;  %v1028_v59 = vadd.f32 %v1027_v56, %v1023_v53 }
 0x1b1   : > { %v1038_v61 = vadd.f32 %v1037_v58, %v1036_v55  ;;  %v1029_v62 = vrot.slane %v1028_v59, 2  ;;  %v1732_v55 = vld [vmem:[#allocation17] sm:$0xff] }
 0x1b2   : > { %1248 = vmatpush.bf16.msrb.mxu1 %v1732_v55 }
 0x1b3   : > { %v1052_v0 = vmul.f32 %v1038_v61, %v2529_v18  ;;  %v1030_v1 = vadd.f32 %v1029_v62, %v1028_v59 }
 0x1b5   : > { %v1056_v3 = vadd.f32 1e-05, %v1052_v0  ;;  %v1031_v4 = vrot.slane %v1030_v1, 1 }
 0x1b7   : > { %1873 = vrsqrt.f32 %v1056_v3  ;;  %v1032_v7 = vadd.f32 %v1031_v4, %v1030_v1  ;;  %vm1075_vm2 = vweird.f32 %v1056_v3 }
 0x1b9   : > { %v1051_v9 = vmul.f32 %v1032_v7, %v2529_v18 }
 0x1bb   : > { %v1055_v12 = vadd.f32 1e-05, %v1051_v9 }
 0x1bd   : > { %v1874_v13 = vpop.eup %1873  ;;  %1875 = vrsqrt.f32 %v1055_v12  ;;  %vm1065_vm5 = vweird.f32 %v1055_v12 }
 0x1be   : > { %v1070_v16 = vmul.f32 %v1874_v13, %v1056_v3  ;;  %vm1076_vm1 = vweird.f32 %v1874_v13  ;;  %1877 = vrsqrt.f32 %v2555_v21 }
 0x1bf   : > { %1879 = vrsqrt.f32 %v2557_v22  ;;  %vm1077_vm3 = vmor %vm1075_vm2, %vm1076_vm1 }
 0x1c0   : > { %v1071_v19 = vmul.f32 %v1874_v13, %v1070_v16  ;;  %v1107_v16 = vperm.slane %v2564_v28, 2 }
 0x1c2   : > { %v1072_v23 = vmul.f32 0.5, %v1071_v19 }
 0x1c3   : > { %v1876_v24 = vpop.eup %1875 }
 0x1c4   : > { %v1073_v25 = vsub.f32 1.5, %v1072_v23  ;;  %v1060_v26 = vmul.f32 %v1876_v24, %v1055_v12  ;;  %vm1066_vm4 = vweird.f32 %v1876_v24  ;;  %v1878_v42 = vpop.eup %1877 }
 0x1c5   : > { %v1880_v44 = vpop.eup %1879  ;;  %vm1067_vm6 = vmor %vm1065_vm5, %vm1066_vm4  ;;  %v1080_v49 = vmul.f32 %v1878_v42, %v2555_v21  ;;  %vm1086_vm9 = vweird.f32 %v1878_v42  ;;  %v1121_v21 = vperm.slane %v2570_v35, 2 }
 0x1c6   : > { %v1074_v30 = vmul.f32 %v1874_v13, %v1073_v25  ;;  %v1061_v31 = vmul.f32 %v1876_v24, %v1060_v26  ;;  %vm1096_vm8 = vweird.f32 %v1880_v44  ;;  %vm1087_vm12 = vmor %vm1085_vm11, %vm1086_vm9  ;;  %v1122_v26 = vperm.slane %v2570_v35, 3 }
 0x1c7   : > { %v1081_v57 = vmul.f32 %v1878_v42, %v1080_v49  ;;  %vm1097_vm10 = vmor %vm1095_vm7, %vm1096_vm8 }
 0x1c8   : > { %v1078_v34 = vsel %vm1077_vm3, %v1874_v13, %v1074_v30  ;;  %v1062_v36 = vmul.f32 0.5, %v1061_v31 }
 0x1c9   : > { %v1100_v38 = vmul.f32 %v1078_v34, %v2542_v40  ;;  %v1090_v40 = vmul.f32 %v1880_v44, %v2557_v22  ;;  %v1082_v62 = vmul.f32 0.5, %v1081_v57 }
 0x1ca   : > { %v1063_v41 = vsub.f32 1.5, %v1062_v36 }
 0x1cb   : > { %v1114_v43 = vmul.f32 %v1106_v33, %v1100_v38  ;;  %v1091_v58 = vmul.f32 %v1880_v44, %v1090_v40  ;;  %v1083_v1 = vsub.f32 1.5, %v1082_v62 }
 0x1cc   : > { %v1064_v45 = vmul.f32 %v1876_v24, %v1063_v41 }
 0x1cd   : > { %v1128_v47 = vadd.f32 %v1120_v39, %v1114_v43  ;;  %v1092_v63 = vmul.f32 0.5, %v1091_v58  ;;  %v1084_v4 = vmul.f32 %v1878_v42, %v1083_v1 }
 0x1ce   : > { %v1068_v51 = vsel %vm1067_vm6, %v1876_v24, %v1064_v45 }
 0x1cf   : > { %v1655_v52 = vmul.f32 -1.442695, %v1128_v47  ;;  %v1099_v53 = vmul.f32 %v1068_v51, %v2547_v50  ;;  %v1093_v2 = vsub.f32 1.5, %v1092_v63  ;;  %v1088_v8 = vsel %vm1087_vm12, %v1878_v42, %v1084_v4 }
 0x1d0   : > { %v1101_v13 = vmul.f32 %v1088_v8, %v2533_v29  ;;  %v1870_v8 = vld [vmem:[%s2677_s3] ss:$0 sm:$0xff] }
 0x1d1   : > { %1881 = vpow2.f32 %v1655_v52  ;;  %v1113_v56 = vmul.f32 %v1105_v48, %v1099_v53  ;;  %v1094_v5 = vmul.f32 %v1880_v44, %v1093_v2 }
 0x1d2   : > { %v1115_v25 = vmul.f32 %v1107_v16, %v1101_v13 }
 0x1d3   : > { %v1127_v59 = vadd.f32 %v1119_v54, %v1113_v56  ;;  %v1098_v9 = vsel %vm1097_vm10, %v1880_v44, %v1094_v5  ;;  %v1868_v44 = vld [vmem:[%s2675_s14] ss:$0 sm:$0xff] }
 0x1d4   : > { %v1102_v14 = vmul.f32 %v1098_v9, %v2535_v32  ;;  %v1129_v36 = vadd.f32 %v1121_v21, %v1115_v25 }
 0x1d5   : > { %v1654_v60 = vmul.f32 -1.442695, %v1127_v59 }
 0x1d6   : > { %v1116_v24 = vmul.f32 %v1108_v15, %v1102_v14 }
 0x1d7   : > { %v1882_v61 = vpop.eup %1881  ;;  %1883 = vpow2.f32 %v1654_v60 }
 0x1d8   : > { %v1153_v0 = vadd.f32 1.0, %v1882_v61  ;;  %v1130_v37 = vadd.f32 %v1122_v26, %v1116_v24 }
 0x1da   : > { %1885 = vrcp.f32 %v1153_v0  ;;  %v1165_v20 = vand.u32 2147483648, %v1153_v0  ;;  %vm1159_vm14 = vweird.f32 %v1153_v0  ;;  %v1163_v23 = vand.u32 2147483647, %v1153_v0 }
 0x1dc   : > { %v1166_v28 = vor.u32 1.1754944e-38, %v1165_v20  ;;  %vm1164_vm2 = vcmp.eq.f32.partialorder %v1163_v23, 8.507059e+37 }
 0x1dd   : > { %v1884_v50 = vpop.eup %1883 }
 0x1de   : > { %v1134_v3 = vadd.f32 1.0, %v1884_v50 }
 0x1e0   : > { %v1886_v6 = vpop.eup %1885  ;;  %1887 = vrcp.f32 %v1134_v3  ;;  %v1146_v29 = vand.u32 2147483648, %v1134_v3  ;;  %v1144_v27 = vand.u32 2147483647, %v1134_v3  ;;  %vm1140_vm1 = vweird.f32 %v1134_v3 }
 0x1e1   : > { %v1155_v7 = vmul.f32 %v1886_v6, %v1153_v0  ;;  %vm1160_vm13 = vweird.f32 %v1886_v6 }
 0x1e2   : > { %vm1161_vm15 = vmor %vm1159_vm14, %vm1160_vm13  ;;  %v1147_v33 = vor.u32 1.1754944e-38, %v1146_v29  ;;  %vm1145_vm4 = vcmp.eq.f32.partialorder %v1144_v27, 8.507059e+37 }
 0x1e3   : > { %v1156_v10 = vsub.f32 1.0, %v1155_v7 }
 0x1e5   : > { %v1157_v11 = vmul.f32 %v1886_v6, %v1156_v10 }
 0x1e6   : > { %v1888_v12 = vpop.eup %1887 }
 0x1e7   : > { %v1136_v17 = vmul.f32 %v1888_v12, %v1134_v3  ;;  %v1158_v19 = vadd.f32 %v1886_v6, %v1157_v11  ;;  %vm1141_vm0 = vweird.f32 %v1888_v12 }
 0x1e8   : > { %vm1142_vm3 = vmor %vm1140_vm1, %vm1141_vm0 }
 0x1e9   : > { %v1137_v22 = vsub.f32 1.0, %v1136_v17  ;;  %v1162_v30 = vsel %vm1161_vm15, %v1886_v6, %v1158_v19  ;;  %v1869_v6 = vld [vmem:[%s2676_s19] ss:$0 sm:$0xff] }
 0x1ea   : > { %v1167_v34 = vsel %vm1164_vm2, %v1166_v28, %v1162_v30 }
 0x1eb   : > { %v1138_v32 = vmul.f32 %v1888_v12, %v1137_v22  ;;  %v1170_v35 = vmul.f32 %v1167_v34, %v1130_v37 }
 0x1ed   : > { %v1139_v31 = vadd.f32 %v1888_v12, %v1138_v32 }
 0x1ef   : > { %v1143_v38 = vsel %vm1142_vm3, %v1888_v12, %v1139_v31 }
 0x1f0   : > { %v1148_v39 = vsel %vm1145_vm4, %v1147_v33, %v1143_v38 }
 0x1f1   : > { %v1169_v41 = vmul.f32 %v1148_v39, %v1129_v36 }
 0x1f3   : > { %v1171_v42 = vadd.f32 %v1170_v35, %v1169_v41 }
 0x1f5   : > { %v1172_v43 = vpack.c.bf16 %v1171_v42, %v1171_v42 }
 0x1f7   : > { %1249 = vmatmul.bf16.vlgmr.msrb.gmra.mxu1 %v1172_v43 }
 0x274   : > { %v1250_v45 = vpop.f32.mrf.mxu1 }
 0x275   : > { %v1251_v46 = vadd.f32 %v1868_v44, %v1250_v45 }
 0x277   : > { %v1254_v47 = vrot.slane %v1251_v46, 4 }
 0x279   : > { %v1255_v48 = vadd.f32 %v1254_v47, %v1251_v46 }
 0x27b   : > { %v1256_v49 = vrot.slane %v1255_v48, 2 }
 0x27c   : > { %v1252_v51 = vpop.f32.mrf.mxu1 }
 0x27d   : > { %v1257_v40 = vadd.f32 %v1256_v49, %v1255_v48 }
 0x27f   : > { %v1258_v52 = vrot.slane %v1257_v40, 1 }
 0x281   : > { %v1259_v53 = vadd.f32 %v1258_v52, %v1257_v40 }
 0x283   : > { %v1260_v54 = vmul.f32 %v1259_v53, %v2529_v18 }
 0x285   : > { %v1261_v55 = vsub.f32 %v1251_v46, %v1260_v54 }
 0x287   : > { %v1262_v56 = vmul.f32 %v1261_v55, %v1261_v55 }
 0x289   : > { %v1263_v57 = vrot.slane %v1262_v56, 4 }
 0x28b   : > { %v1264_v58 = vadd.f32 %v1263_v57, %v1262_v56 }
 0x28d   : > { %v1265_v59 = vrot.slane %v1264_v58, 2 }
 0x28f   : > { %v1266_v60 = vadd.f32 %v1265_v59, %v1264_v58 }
 0x291   : > { %v1267_v61 = vrot.slane %v1266_v60, 1 }
 0x293   : > { %v1268_v62 = vadd.f32 %v1267_v61, %v1266_v60 }
 0x295   : > { %v1269_v63 = vmul.f32 %v1268_v62, %v2529_v18 }
 0x297   : > { %v1270_v0 = vadd.f32 1e-05, %v1269_v63 }
 0x299   : > { %1889 = vrsqrt.f32 %v1270_v0  ;;  %vm1277_vm6 = vweird.f32 %v1270_v0 }
 0x29f   : > { %v1890_v1 = vpop.eup %1889 }
 0x2a0   : > { %v1272_v2 = vmul.f32 %v1890_v1, %v1270_v0  ;;  %vm1278_vm5 = vweird.f32 %v1890_v1 }
 0x2a1   : > { %vm1279_vm7 = vmor %vm1277_vm6, %vm1278_vm5 }
 0x2a2   : > { %v1273_v50 = vmul.f32 %v1890_v1, %v1272_v2 }
 0x2a4   : > { %v1274_v3 = vmul.f32 0.5, %v1273_v50 }
 0x2a6   : > { %v1275_v4 = vsub.f32 1.5, %v1274_v3 }
 0x2a8   : > { %v1276_v5 = vmul.f32 %v1890_v1, %v1275_v4 }
 0x2aa   : > { %v1280_v7 = vsel %vm1279_vm7, %v1890_v1, %v1276_v5 }
 0x2ab   : > { %v1281_v18 = vmul.f32 %v1280_v7, %v1261_v55 }
 0x2ad   : > { %v1286_v9 = vmul.f32 %v1869_v6, %v1281_v18 }
 0x2af   : > { %v1291_v10 = vadd.f32 %v1870_v8, %v1286_v9 }
 0x2b1   : > { %v1292_v11 = vmax.f32 %v1291_v10, 0.0 }
 0x2b3   : > { %1293 = vst [vmem:[%s632_s27] sm:$0xff] %v1292_v11 }
 0x2b4   : > { %2188 = shalt.err (!%p2185_p8)
}
 0x2b5   : > { %1772 = dma.vmem_to_hbm [thread:$0]  (%p2441_p13), %s1308_s20, 128, %s1310_s26, %s1295_s2  }
 0x2b6 PF: > { %p1822_p10 = scmp.ge.s32.totalorder %s2247_s16, 2  ;;  %s1321_s6 = sand.u32 1, %s2235_s29  }
 0x2b7   : > { %s1322_s12 = scalar_lea.sflag [#allocation5], %s1321_s6 }
 0x2b8   : > { %p1804_p9 = pnand %p1822_p10, %p2447_p4 }
 0x2ba   : > { %p1805_p11 = pneg %p1804_p9 }
 0x2bc   : > { %2230 = dma.done.wait (%p1805_p11), %s1322_s12, 128  }
 0x2bd   : > { %2232 = vsyncadd (%p1805_p11), %s1322_s12, 4294967168  ;;  %s2679_s19 = sld [smem:[#allocation26_spill]]  ;;  %p33_p0 = scmp.ge.s32.totalorder %s2417_s23, 6  }
 0x2be   : > { %s2680_s15 = sld [smem:[#allocation27_spill]]  ;;  %s2681_s29 = smov %s2239_s30 }
 0x2bf   : > { %s2683_s16 = smov %s2417_s23  ;;  %35 = sbr.rel (!%p33_p0) target bundleno = 22 (0x16), region = 162 }
 0x2c3   : > { %s2682_s30 = smov %s2679_s19 }
 0x2c4   :  { %1328 = vsyncpa [#allocation4], 1 }
 0x2c5   :  { %1330 = vsyncpa [#allocation4 + $0x1], 1 }
 0x2c6   :  { %1331 = vsyncpa [#allocation7], 1 }
 0x2c7   :  { %1333 = vsyncpa [#allocation7 + $0x1], 1 }
 0x2c8   :  { %1334 = vsyncpa [#allocation10], 1 }
 0x2c9   :  { %1335 = vsyncpa [#allocation13], 1 }
 0x2ca   :  { %1336 = vsyncpa [#allocation16], 1 }
 0x2cb   :  { %1337 = vsyncpa [#allocation5], 1 }
 0x2cc   :  { %1339 = vsyncpa [#allocation5 + $0x1], 1 }

</bundles_post_ra>
